<compile_context>
chip_gen: v7x
topology: tpu7x:2x2x1
jax: 0.10.0
libtpu: 0.0.40
codegen_flags: <defaults>
</compile_context>

<pallas_src>
import jax
import jax.numpy as jnp
from jax.experimental import pallas as pl
from jax.experimental.pallas import tpu as pltpu


def _conv_mm_kernel(lhs_ref, rhs_ref, b_ref, o_ref):
    # lhs_ref: (row_tile, Kc)   bf16
    # rhs_ref: (Kc, W*Cout)     bf16 (block-Toeplitz weights, constant block)
    # b_ref:   (1, W*Cout)      f32  (constant block)
    # o_ref:   (row_tile, W*Cout) f32
    acc = jnp.dot(lhs_ref[...], rhs_ref[...],
                  preferred_element_type=jnp.float32)   # single MXU pass / tile
    o_ref[...] = acc + b_ref[...]                       # lane-dense f32 store


def _choose_row_tile(NH, Kc, WCo, budget_bytes=24 << 20, max_tile=1024):
    """VMEM-budget-aware row tile (multiple of 16 for bf16 sublane packing)."""
    # per-step bytes ~ 2*rt*Kc*2 (double-buffered bf16 LHS)
    #               + 2*Kc*WCo*2 (resident bf16 RHS, 2 buffers)
    #               + 2*rt*WCo*4 (double-buffered f32 out) + tiny bias block
    fixed = 2 * (Kc * WCo * 2) + 2 * (8 * WCo * 4)
    per_row = 2 * (Kc * 2) + 2 * (WCo * 4)
    rt = max(16, ((budget_bytes - fixed) // per_row) // 16 * 16)
    rt = min(rt, max_tile)
    # Feed both v7x TensorCores: >=2 parallel grid steps whenever NH permits.
    if NH >= 32:
        rt = min(rt, 16 * pl.cdiv(NH, 32))   # ~= ceil(NH/2) rounded to mult of 16
    return max(rt, 16)


def conv2d_pallas(x_nchw, weight, bias, kernel_size,
                  matmul_dtype=jnp.bfloat16):
    """x_nchw: (N, Cin, H, W); weight: (Cout, Cin, K, K); bias: (Cout,)."""
    N, Cin, H, W = x_nchw.shape
    Cout = weight.shape[0]
    K = kernel_size
    Wp = W + K - 1

    # ---- glue: NHWC layout, cast to bf16 FIRST, asymmetric pad (W left, H bottom) ----
    x_nhwc = jnp.transpose(x_nchw, (0, 2, 3, 1)).astype(matmul_dtype)   # (N,H,W,Cin)
    x_pad = jnp.pad(x_nhwc, ((0, 0), (0, K - 1), (K - 1, 0), (0, 0)))   # (N,Hp,Wp,Cin)

    # ---- LHS rows: batch folded into rows; one row per output (n, h) (built in bf16) ----
    lhs = jnp.stack([x_pad[:, kh:kh + H] for kh in range(K)], axis=2)   # (N,H,K,Wp,Cin)
    lhs = lhs.reshape(N * H, K * Wp * Cin)

    # ---- RHS: block-Toeplitz weights via ONE einsum against a 0/1 indicator ----
    # rhs[kh, wp, ci, w, co] = weight[co, ci, kh, kw] where wp == w + kw
    w_hwio = jnp.transpose(weight, (2, 3, 1, 0)).astype(matmul_dtype)   # (K,K,Cin,Cout)
    kw_idx = jnp.arange(K)[:, None, None]
    wp_idx = jnp.arange(Wp)[None, :, None]
    w_idx = jnp.arange(W)[None, None, :]
    ind = (wp_idx == w_idx + kw_idx).astype(matmul_dtype)               # (K,Wp,W)
    rhs = jnp.einsum('hkio,kpw->hpiwo', w_hwio, ind)                    # (K,Wp,Cin,W,Cout)
    rhs = rhs.reshape(K * Wp * Cin, W * Cout)

    # Bias broadcast once over the fused (w, cout) lane axis; added in f32.
    b_row = jnp.tile(bias.astype(jnp.float32), W).reshape(1, W * Cout)

    NH, Kc, WCo = N * H, K * Wp * Cin, W * Cout

    # ---- VMEM-budget-aware row tiling; pad ragged NH with zero rows ----
    row_tile = _choose_row_tile(NH, Kc, WCo)
    grid_rows = pl.cdiv(NH, row_tile)
    NH_pad = grid_rows * row_tile
    if NH_pad != NH:
        lhs = jnp.pad(lhs, ((0, NH_pad - NH), (0, 0)))

    cost = pl.CostEstimate(
        flops=2 * NH_pad * Kc * WCo,
        transcendentals=0,
        bytes_accessed=(NH_pad * Kc * 2 + Kc * WCo * 2 + WCo * 4
                        + NH_pad * WCo * 4))

    out2d = pl.pallas_call(
        _conv_mm_kernel,
        out_shape=jax.ShapeDtypeStruct((NH_pad, WCo), jnp.float32),
        grid_spec=pltpu.PrefetchScalarGridSpec(
            num_scalar_prefetch=0,
            grid=(grid_rows,),
            in_specs=[
                pl.BlockSpec((row_tile, Kc), lambda i: (i, 0)),
                pl.BlockSpec((Kc, WCo), lambda i: (0, 0)),   # constant block: no re-DMA
                pl.BlockSpec((1, WCo), lambda i: (0, 0)),    # constant block: no re-DMA
            ],
            out_specs=pl.BlockSpec((row_tile, WCo), lambda i: (i, 0)),
        ),
        compiler_params=pltpu.CompilerParams(
            dimension_semantics=("parallel",),
            vmem_limit_bytes=32 << 20),
        cost_estimate=cost,
    )(lhs, rhs, b_row)

    out_nhwc = out2d[:NH].reshape(N, H, W, Cout).astype(x_nchw.dtype)   # un-fuse lanes
    # Module returns NCHW -> keep the layout transpose (semantics over glue savings).
    return jnp.transpose(out_nhwc, (0, 3, 1, 2))


if __name__ == "__main__":
    # Module config (small, consistent with the forward pass).
    in_features, out_features, kernel_size = 4, 8, 3
    N, H, W = 2, 16, 16

    key = jax.random.PRNGKey(0)
    kx, kw, kb = jax.random.split(key, 3)

    # Deterministic init matching torch.nn.Conv2d default (uniform +/- 1/sqrt(fan_in)).
    fan_in = in_features * kernel_size * kernel_size
    bound = 1.0 / (fan_in ** 0.5)
    weight = jax.random.uniform(
        kw, (out_features, in_features, kernel_size, kernel_size),
        minval=-bound, maxval=bound, dtype=jnp.float32)
    bias = jax.random.uniform(
        kb, (out_features,), minval=-bound, maxval=bound, dtype=jnp.float32)
    x = jax.random.normal(kx, (N, in_features, H, W), dtype=jnp.float32)

    conv = jax.jit(lambda xx, ww, bb: conv2d_pallas(xx, ww, bb, kernel_size))
    out = conv(x, weight, bias)
    jax.block_until_ready(out)
    assert out.shape == (N, out_features, H, W)

    pad = ((0, kernel_size - 1), (kernel_size - 1, 0))

    # Apples-to-apples check: reference with the same bf16 operands / f32 accumulation.
    ref_mixed = jax.lax.conv_general_dilated(
        x.astype(jnp.bfloat16), weight.astype(jnp.bfloat16),
        window_strides=(1, 1), padding=pad,
        dimension_numbers=("NCHW", "OIHW", "NCHW"),
        preferred_element_type=jnp.float32) + bias[None, :, None, None]
    assert jnp.allclose(out, ref_mixed, atol=1e-4, rtol=1e-4)

    # Semantics check vs the full-f32 conv (kernel uses bf16 MXU operands,
    # f32 accumulation -> small mixed-precision tolerance).
    ref_f32 = jax.lax.conv_general_dilated(
        x, weight, window_strides=(1, 1), padding=pad,
        dimension_numbers=("NCHW", "OIHW", "NCHW"),
        precision=jax.lax.Precision.HIGHEST) + bias[None, :, None, None]
    assert jnp.allclose(out, ref_f32, atol=5e-2, rtol=5e-2)

    print("KERNEL_OK")
</pallas_src>

<mosaic_0001>
module attributes {stable_mosaic.version = 11 : i64} {
  func.func @_conv_mm_kernel(%arg0: i32, %arg1: memref<16x216xbf16, #tpu.memory_space<vmem>>, %arg2: memref<216x128xbf16, #tpu.memory_space<vmem>>, %arg3: memref<1x128xf32, #tpu.memory_space<vmem>>, %arg4: memref<16x128xf32, #tpu.memory_space<vmem>>) attributes {dimension_semantics = [#tpu.dimension_semantics<parallel>], iteration_bounds = array<i64: 2>, scalar_prefetch = 0 : i64, scratch_operands = 0 : i64, tpu.core_type = #tpu.core_type<tc>, window_params = [{transform_indices = @transform_0, window_bounds = array<i64: 16, 216>}, {pipeline_mode = #tpu.pipeline_mode<synchronous>, transform_indices = @transform_1, window_bounds = array<i64: 216, 128>}, {pipeline_mode = #tpu.pipeline_mode<synchronous>, transform_indices = @transform_2, window_bounds = array<i64: 1, 128>}, {transform_indices = @transform_3, window_bounds = array<i64: 16, 128>}]} {
    %c0 = arith.constant 0 : index
    %c0_0 = arith.constant 0 : index
    %0 = vector.load %arg1[%c0, %c0_0] : memref<16x216xbf16, #tpu.memory_space<vmem>>, vector<16x216xbf16>
    %c0_1 = arith.constant 0 : index
    %c0_2 = arith.constant 0 : index
    %1 = vector.load %arg2[%c0_1, %c0_2] : memref<216x128xbf16, #tpu.memory_space<vmem>>, vector<216x128xbf16>
    %cst = arith.constant dense<0.000000e+00> : vector<16x128xf32>
    %2 = tpu.matmul %0, %1, %cst {dimension_numbers = #tpu.dot_dimension_numbers<[1], [0], [0], [1], [0, 0, 1, 1], [], []>} : vector<16x216xbf16>, vector<216x128xbf16>, vector<16x128xf32> -> vector<16x128xf32>
    %c0_3 = arith.constant 0 : index
    %c0_4 = arith.constant 0 : index
    %3 = vector.load %arg3[%c0_3, %c0_4] : memref<1x128xf32, #tpu.memory_space<vmem>>, vector<1x128xf32>
    %4 = vector.broadcast %3 : vector<1x128xf32> to vector<16x128xf32>
    %5 = arith.addf %2, %4 : vector<16x128xf32>
    %c0_5 = arith.constant 0 : index
    %c0_6 = arith.constant 0 : index
    %6 = vector.load %arg4[%c0_5, %c0_6] : memref<16x128xf32, #tpu.memory_space<vmem>>, vector<16x128xf32>
    tpu.vector_store %arg4[%c0_5, %c0_6], %5 {strides = array<i32>} : memref<16x128xf32, #tpu.memory_space<vmem>>, vector<16x128xf32>,
    return
  }
  func.func @transform_0(%arg0: i32) -> (i32, i32) {
    %c0_i32 = arith.constant 0 : i32
    %c0_i32_0 = arith.constant 0 : i32
    return %arg0, %c0_i32 : i32, i32
  }
  func.func @transform_1(%arg0: i32) -> (i32, i32) {
    %c0_i32 = arith.constant 0 : i32
    %c0_i32_0 = arith.constant 0 : i32
    %c0_i32_1 = arith.constant 0 : i32
    return %c0_i32, %c0_i32_0 : i32, i32
  }
  func.func @transform_2(%arg0: i32) -> (i32, i32) {
    %c0_i32 = arith.constant 0 : i32
    %c0_i32_0 = arith.constant 0 : i32
    %c0_i32_1 = arith.constant 0 : i32
    return %c0_i32, %c0_i32_0 : i32, i32
  }
  func.func @transform_3(%arg0: i32) -> (i32, i32) {
    %c0_i32 = arith.constant 0 : i32
    %c0_i32_0 = arith.constant 0 : i32
    return %arg0, %c0_i32 : i32, i32
  }
}

</mosaic_0001>

<bundles_post_ra>
// kernel: tile.8
= control target key start
LH: loop header
LB: loop body
LE: loop exit
PB: predicated region body
PF: predicated region fallthrough
CT: control target
= control target key end

     0   :  { %s28_s0 = inlined_call_operand.vmem [shape: f32[8], index: 0, kind: input, shape index: {}]   ;;  %s29_s1 = inlined_call_operand.vmem [shape: f32[16,8], index: 1, kind: output, shape index: {}]  }
   0x1   :  { %v4_v0 = vld [vmem:[%s28_s0] ss:$0 sm:$0xff] }
   0x2   :  { %5 = vst [vmem:[%s29_s1] sm:$0xff] %v4_v0  ;;  %8 = vst [vmem:[%s29_s1 + $0x8] sm:$0xff] %v4_v0 }

// kernel: tile.9
= control target key start
LH: loop header
LB: loop body
LE: loop exit
PB: predicated region body
PF: predicated region fallthrough
CT: control target
= control target key end

     0   :  { %s131_s10 = smov 120   ;;  %s132_s11 = smov 104   ;;  %vm3_vm0 = vcmask 64512   ;;  %vm9_vm1 = vcmask 1048512   ;;  %vm15_vm2 = vcmask 982912   ;;  %vm21_vm3 = vcmask 917312   ;;  %s207_s0 = inlined_call_operand.vmem [shape: f32[16,8], index: 0, kind: input, shape index: {}]   ;;  %s208_s1 = inlined_call_operand.vmem [shape: f32[1,128], index: 1, kind: output, shape index: {}]  }
   0x1   :  { %v101_v0 = vld [vmem:[%s207_s0 + $0xf] sm:$0x1]   ;;  %v103_v1 = vld [vmem:[%s207_s0 + $0xd] sm:$0x1]   ;;  %v102_v2 = vld [vmem:[%s207_s0 + $0xe] sm:$0x1]  }
   0x2   :  { %7 = vrot.lane.b32.xlu0 %v101_v0, %s131_s10  ;;  %19 = vrot.lane.b32.xlu1 %v103_v1, %s132_s11  ;;  %v104_v3 = vld [vmem:[%s207_s0 + $0xc] sm:$0x1]   ;;  %s133_s16 = smov 112   ;;  %s134_s17 = smov 96   ;;  %v105_v4 = vld [vmem:[%s207_s0 + $0xb] sm:$0x1]  }
   0x3   :  { %v106_v5 = vld [vmem:[%s207_s0 + $0xa] sm:$0x1]   ;;  %v2_v6 = vld [vmem:[%s207_s0] sm:$0x1]   ;;  %s135_s24 = smov 88   ;;  %s136_s25 = smov 80  }
   0x4   :  { %4 = vst.msk [vmem:[#allocation0] sm:$0x1] %vm3_vm0, %v2_v6   ;;  %v107_v7 = vld [vmem:[%s207_s0 + $0x9] sm:$0x1]   ;;  %v108_v8 = vld [vmem:[%s207_s0 + $0x8] sm:$0x1]  }
   0x5   :  { %s137_s30 = smov 72   ;;  %s138_s2 = smov 64   ;;  %v109_v9 = vld [vmem:[%s207_s0 + $0x7] sm:$0x1]   ;;  %v110_v10 = vld [vmem:[%s207_s0 + $0x6] sm:$0x1]  }
   0x6   :  { %13 = vrot.lane.b32.xlu0 %v102_v2, %s133_s16  ;;  %25 = vrot.lane.b32.xlu1 %v104_v3, %s134_s17  ;;  %s139_s7 = smov 56   ;;  %s140_s8 = smov 48   ;;  %v111_v11 = vld [vmem:[%s207_s0 + $0x5] sm:$0x1]   ;;  %v112_v12 = vld [vmem:[%s207_s0 + $0x4] sm:$0x1]  }
   0x7   :  { %s141_s13 = smov 40   ;;  %s142_s14 = smov 32   ;;  %v113_v13 = vld [vmem:[%s207_s0 + $0x3] sm:$0x1]   ;;  %v114_v14 = vld [vmem:[%s207_s0 + $0x2] sm:$0x1]  }
   0x8   :  { %s143_s19 = smov 24   ;;  %s144_s20 = smov 16   ;;  %v115_v15 = vld [vmem:[%s207_s0 + $0x1] sm:$0x1]   ;;  %vm27_vm4 = vcmask 851712   ;;  %vm33_vm5 = vcmask 786112  }
   0x9   :  { %s145_s0 = smov 8   ;;  %vm39_vm6 = vcmask 720512   ;;  %vm45_vm7 = vcmask 654912   ;;  %vm51_vm8 = vcmask 589312   ;;  %vm57_vm9 = vcmask 523712  }
   0xa   :  { %31 = vrot.lane.b32.xlu0 %v105_v4, %s135_s24  ;;  %37 = vrot.lane.b32.xlu1 %v106_v5, %s136_s25  ;;  %vm63_vm10 = vcmask 458112   ;;  %vm69_vm11 = vcmask 392512   ;;  %vm75_vm12 = vcmask 326912   ;;  %vm81_vm13 = vcmask 261312  }
   0xb   :  { %vm87_vm14 = vcmask 195712   ;;  %vm93_vm15 = vcmask 130112  }
   0xe   :  { %43 = vrot.lane.b32.xlu0 %v107_v7, %s137_s30  ;;  %49 = vrot.lane.b32.xlu1 %v108_v8, %s138_s2 }
  0x12   :  { %55 = vrot.lane.b32.xlu0 %v109_v9, %s139_s7  ;;  %61 = vrot.lane.b32.xlu1 %v110_v10, %s140_s8 }
  0x16   :  { %67 = vrot.lane.b32.xlu0 %v111_v11, %s141_s13  ;;  %73 = vrot.lane.b32.xlu1 %v112_v12, %s142_s14 }
  0x1a   :  { %79 = vrot.lane.b32.xlu0 %v113_v13, %s143_s19  ;;  %85 = vrot.lane.b32.xlu1 %v114_v14, %s144_s20 }
  0x1e   :  { %91 = vrot.lane.b32.xlu0 %v115_v15, %s145_s0 }
  0x74   :  { %v8_v16 = vpop.permute.xlu0 %7   ;;  %v20_v17 = vpop.permute.xlu1 %19  }
  0x75   :  { %10 = vst.msk [vmem:[#allocation0] sm:$0x1] %vm9_vm1, %v8_v16  }
  0x78   :  { %v14_v18 = vpop.permute.xlu0 %13   ;;  %v26_v19 = vpop.permute.xlu1 %25  }
  0x79   :  { %16 = vst.msk [vmem:[#allocation0] sm:$0x1] %vm15_vm2, %v14_v18  }
  0x7a   :  { %22 = vst.msk [vmem:[#allocation0] sm:$0x1] %vm21_vm3, %v20_v17  }
  0x7b   :  { %28 = vst.msk [vmem:[#allocation0] sm:$0x1] %vm27_vm4, %v26_v19  }
  0x7c   :  { %v32_v20 = vpop.permute.xlu0 %31   ;;  %v38_v21 = vpop.permute.xlu1 %37  }
  0x7d   :  { %34 = vst.msk [vmem:[#allocation0] sm:$0x1] %vm33_vm5, %v32_v20  }
  0x7e   :  { %40 = vst.msk [vmem:[#allocation0] sm:$0x1] %vm39_vm6, %v38_v21  }
  0x80   :  { %v44_v22 = vpop.permute.xlu0 %43   ;;  %v50_v23 = vpop.permute.xlu1 %49  }
  0x81   :  { %46 = vst.msk [vmem:[#allocation0] sm:$0x1] %vm45_vm7, %v44_v22  }
  0x82   :  { %52 = vst.msk [vmem:[#allocation0] sm:$0x1] %vm51_vm8, %v50_v23  }
  0x84   :  { %v56_v24 = vpop.permute.xlu0 %55   ;;  %v62_v25 = vpop.permute.xlu1 %61  }
  0x85   :  { %58 = vst.msk [vmem:[#allocation0] sm:$0x1] %vm57_vm9, %v56_v24  }
  0x86   :  { %64 = vst.msk [vmem:[#allocation0] sm:$0x1] %vm63_vm10, %v62_v25  }
  0x88   :  { %v68_v26 = vpop.permute.xlu0 %67   ;;  %v74_v27 = vpop.permute.xlu1 %73  }
  0x89   :  { %70 = vst.msk [vmem:[#allocation0] sm:$0x1] %vm69_vm11, %v68_v26  }
  0x8a   :  { %76 = vst.msk [vmem:[#allocation0] sm:$0x1] %vm75_vm12, %v74_v27  }
  0x8c   :  { %v80_v28 = vpop.permute.xlu0 %79   ;;  %v86_v29 = vpop.permute.xlu1 %85  }
  0x8d   :  { %82 = vst.msk [vmem:[#allocation0] sm:$0x1] %vm81_vm13, %v80_v28  }
  0x8e   :  { %88 = vst.msk [vmem:[#allocation0] sm:$0x1] %vm87_vm14, %v86_v29  }
  0x90   :  { %v92_v30 = vpop.permute.xlu0 %91  }
  0x91   :  { %94 = vst.msk [vmem:[#allocation0] sm:$0x1] %vm93_vm15, %v92_v30  }
  0x98   :  { %v98_v31 = vld [vmem:[#allocation0] sm:$0x1] }
  0x99   :  { %100 = vst [vmem:[%s208_s1] sm:$0x1] %v98_v31 }

// kernel: _lambda_.1
= control target key start
LH: loop header
LB: loop body
LE: loop exit
PB: predicated region body
PF: predicated region fallthrough
CT: control target
= control target key end

     0   :  { %s497_s12 = smov 0   ;;  %s570_s0 = inlined_call_operand.vmem [shape: bf16[32,216], index: 0, kind: input, shape index: {}]   ;;  %s571_s1 = inlined_call_operand.vmem [shape: bf16[216,128], index: 1, kind: input, shape index: {}]   ;;  %s572_s2 = inlined_call_operand.vmem [shape: f32[1,128], index: 2, kind: input, shape index: {}]   ;;  %s573_s3 = inlined_call_operand.vmem [shape: f32[32,128], index: 3, kind: output, shape index: {}]  }
   0x1 LB: > { %s411_s13 = sadd.s32 4294967295, %s474_s12   ;;  %p415_p0 = scmp.ge.s32.totalorder %s474_s12, 1  ;;  %s474_s12 = sphi %s497_s12, %s13_s12  }
   0x2   : > { %p139_p1 = scmp.lt.s32.totalorder %s474_s12, 3 }
   0x4   : > { %p140_p2 = pnand %p415_p0, %p139_p1 }
   0x5   : > { %v451_v0 = vld [vmem:[%s571_s1] sm:$0xff] (!%p140_p2)   ;;  %v476_v1 = vmov (!%p140_p2), 0   ;;  %v452_v2 = vld [vmem:[%s571_s1 + $0x8] sm:$0xff] (!%p140_p2)   ;;  %s416_s18 = sshll.u32 (!%p140_p2), %s411_s13, 1  ;;  %v453_v3 = vld [vmem:[%s571_s1 + $0x10] sm:$0xff] (!%p140_p2)   ;;  %vm304_vm0 = vcmask (!%p140_p2), 719872  }
   0x6   : > { %143 = sbr.rel (%p140_p2) target bundleno = 279 (0x117), region = 32  ;;  %312 = vmatprep.subr.bf16.mxu0 (!%p140_p2), %v476_v1  ;;  %p165_p3 = scmp.lt.s32.totalorder (!%p140_p2), %s416_s18, 3  ;;  %v454_v4 = vld [vmem:[%s571_s1 + $0x18] sm:$0xff] (!%p140_p2)   ;;  %v455_v5 = vld [vmem:[%s571_s1 + $0x20] sm:$0xff] (!%p140_p2)   ;;  %v456_v7 = vld [vmem:[%s571_s1 + $0x28] sm:$0xff] (!%p140_p2)   ;;  %vm308_vm1 = vcmask (!%p140_p2), 1043456  }
   0x7   : > { %313 = vmatpush1.bf16.msra.mxu0 (!%p140_p2), %v451_v0  ;;  %v457_v8 = vld [vmem:[%s571_s1 + $0x30] sm:$0xff] (!%p140_p2)   ;;  %v458_v9 = vld [vmem:[%s571_s1 + $0x38] sm:$0xff] (!%p140_p2)   ;;  %v459_v10 = vld [vmem:[%s571_s1 + $0x40] sm:$0xff] (!%p140_p2)  }
   0x8   : > { %314 = vmatprep.subr.bf16.mxu0 (!%p140_p2), %v476_v1  ;;  %v460_v11 = vld [vmem:[%s571_s1 + $0x48] sm:$0xff] (!%p140_p2)   ;;  %v461_v12 = vld [vmem:[%s571_s1 + $0x50] sm:$0xff] (!%p140_p2)   ;;  %v462_v13 = vld [vmem:[%s571_s1 + $0x58] sm:$0xff] (!%p140_p2)  }
   0x9   : > { %v463_v14 = vld [vmem:[%s571_s1 + $0x60] sm:$0xff] (!%p140_p2)   ;;  %v464_v15 = vld [vmem:[%s571_s1 + $0x68] ss:$0 sps:$4 sm:$0xff] (!%p140_p2)  }
   0xa   : > { %v310_v16 = vsel (!%p140_p2), %vm308_vm1, %v464_v15, 0  ;;  %v421_v18 = vld [vmem:[%s572_s2] ss:$0 sm:$0xff] (!%p140_p2) }
   0xb   : > { %315 = vmatpush1.bf16.msra.mxu0 (!%p140_p2), %v452_v2 }
   0xc   : > { %316 = vmatprep.subr.bf16.mxu0 (!%p140_p2), %v476_v1 }
   0xd   : > { %s575_s18 = smov (!%p165_p3, %s416_s18), 3 }
   0xe   : > { %s441_s21 = sshll.u32 %s575_s18, 3 }
   0xf   : > { %317 = vmatpush1.bf16.msra.mxu0 %v453_v3  ;;  %s525_s26 = scalar_lea.vmem %s570_s0, %s441_s21  ;;  %s175_s28 = scalar_lea.vmem %s573_s3, %s441_s21 }
  0x10   : > { %318 = vmatprep.subr.bf16.mxu0 %v476_v1  ;;  %v467_v6 = vld [vmem:[%s525_s26 + $0x4] ss:$8 sps:$4 sm:$0xff]   ;;  %v465_v17 = vld [vmem:[%s525_s26] ss:$8 sps:$4 sm:$0xff]  }
  0x11   : > { %438 = vmatprep.mubr.msk.bf16.mxu0 %vm304_vm0, %v467_v6 }
  0x13   : > { %319 = vmatpush1.bf16.msra.mxu0 %v454_v4 }
  0x14   : > { %320 = vmatprep.subr.bf16.mxu0 %v476_v1 }
  0x17   : > { %321 = vmatpush1.bf16.msra.mxu0 %v455_v5 }
  0x18   : > { %322 = vmatprep.subr.bf16.mxu0 %v476_v1 }
  0x1b   : > { %323 = vmatpush1.bf16.msra.mxu0 %v456_v7 }
  0x1c   : > { %324 = vmatprep.subr.bf16.mxu0 %v476_v1 }
  0x1f   : > { %325 = vmatpush1.bf16.msra.mxu0 %v457_v8 }
  0x20   : > { %326 = vmatprep.subr.bf16.mxu0 %v476_v1 }
  0x23   : > { %327 = vmatpush1.bf16.msra.mxu0 %v458_v9 }
  0x24   : > { %328 = vmatprep.subr.bf16.mxu0 %v476_v1 }
  0x27   : > { %329 = vmatpush1.bf16.msra.mxu0 %v459_v10 }
  0x28   : > { %330 = vmatprep.subr.bf16.mxu0 %v476_v1 }
  0x2b   : > { %331 = vmatpush1.bf16.msra.mxu0 %v460_v11 }
  0x2c   : > { %332 = vmatprep.subr.bf16.mxu0 %v476_v1 }
  0x2f   : > { %333 = vmatpush1.bf16.msra.mxu0 %v461_v12 }
  0x30   : > { %334 = vmatprep.subr.bf16.mxu0 %v476_v1 }
  0x33   : > { %335 = vmatpush1.bf16.msra.mxu0 %v462_v13 }
  0x34   : > { %336 = vmatprep.subr.bf16.mxu0 %v476_v1 }
  0x37   : > { %337 = vmatpush1.bf16.msra.mxu0 %v463_v14 }
  0x38   : > { %338 = vmatprep.subr.bf16.mxu0 %v476_v1 }
  0x3b   : > { %339 = vmatpush1.bf16.msra.mxu0 %v310_v16 }
  0x3e   : > { %345 = vmatmul.mubr.bf16.vlgmr.msra.gmra.mrb[0].mxu0 %v465_v17 }
 0x111   : > { %v346_v19 = vpop.f32.mrb[0].mxu0 }
 0x112   : > { %v347_v20 = vadd.f32 %v421_v18, %v346_v19  ;;  %v348_v21 = vpop.f32.mrb[1].mxu0 }
 0x113   : > { %v349_v22 = vpop.f32.mrb[2].mxu0 }
 0x114   : > { %353 = vst [vmem:[%s175_s28] sm:$0xff] %v347_v20  ;;  %v350_v23 = vadd.f32 %v421_v18, %v349_v22  ;;  %v351_v24 = vpop.f32.mrb[3].mxu0 }
 0x116   : > { %354 = vst [vmem:[%s175_s28 + $0x8] sm:$0xff] %v350_v23 }
 0x117 PF: > { %s13_s12 = sadd.s32 1, %s474_s12  }
 0x118   : > { %p10_p4 = scmp.ge.s32.totalorder %s13_s12, 4  }
 0x11a   :  { %12 = sbr.rel (!%p10_p4) target bundleno = 1 (0x1), region = 62 }

</bundles_post_ra>
